<compile_context>
chip_gen: v6e
topology: v6e:2x2x1
jax: 0.10.0
libtpu: 0.0.40
codegen_flags: <defaults>
</compile_context>

<pallas_src>
import functools

import jax
import jax.numpy as jnp
from jax.experimental import pallas as pl
from jax.experimental.pallas import tpu as pltpu

KERNEL = 3
PAD = 1
LEAKY_SLOPE = 0.2
_SUBLANE = 8
_LANE = 128


def _conv3x3_lrelu_kernel(x_ref, *rest, W, rows, imgs, use_halo, mxu_dtype):
    """3x3 same-padding conv + bias + LeakyReLU(0.2) on one row block.

    x_ref : (imgs, Cin_p, rows*W)   channels on sublanes, flat spatial on lanes.
    [top_ref, bot_ref] : (1, Cin_p, 8, W)  8-row bands holding the halo rows
                                    (present only when use_halo).
    w_ref : (Cout, 9*Cin_p)         tap-major (kh, kw), channel-minor, mxu_dtype.
    b_ref : (Cout, 1)               float32.
    o_ref : (imgs, Cout, rows*W)
    """
    if use_halo:
        top_ref, bot_ref, w_ref, b_ref, o_ref = rest
    else:
        w_ref, b_ref, o_ref = rest

    RW = rows * W
    cin_p = x_ref.shape[1]

    w = w_ref[...]                                    # (Cout, 9*Cin_p)
    b = b_ref[...]                                    # (Cout, 1) f32

    # Column-boundary masks, hoisted out of the 9-tap loop (computed once).
    col = jax.lax.broadcasted_iota(jnp.int32, (1, RW), 1) % W
    col_ok = {-1: col >= 1, 0: None, 1: col <= W - 2}

    zero_row = jnp.zeros((cin_p, W), mxu_dtype)
    zero_one = jnp.zeros((cin_p, 1), mxu_dtype)

    if use_halo:
        rb = pl.program_id(1)
        # Last row of the band above / first row of the band below this block.
        top = top_ref[0, :, _SUBLANE - 1, :].astype(mxu_dtype)
        bot = bot_ref[0, :, 0, :].astype(mxu_dtype)
        # Global image boundary -> zero padding instead of the (clamped) halo.
        top = jnp.where(rb == 0, zero_row, top)
        bot = jnp.where(rb == pl.num_programs(1) - 1, zero_row, bot)
    else:
        top = zero_row
        bot = zero_row

    for n in range(imgs):
        x_img = x_ref[n].astype(mxu_dtype)            # (Cin_p, RW)
        # Halo-extended block: [1 pad | top row | block | bottom row | 1 pad].
        # For tap (kh, kw), the value feeding output position p is
        # ext[:, p + kh*W + kw]; only column validity still needs masking.
        ext = jnp.concatenate([zero_one, top, x_img, bot, zero_one], axis=1)

        taps = []
        for kh in range(KERNEL):
            for kw in range(KERNEL):
                off = kh * W + kw
                tap = ext[:, off:off + RW]
                mask = col_ok[kw - PAD]
                if mask is not None:
                    tap = jnp.where(mask, tap, jnp.zeros_like(tap))
                taps.append(tap)
        # Cin_p % 8 == 0 -> every tap starts at an 8-aligned sublane offset, so
        # this concat is plain stores (no relayout).
        patch = jnp.concatenate(taps, axis=0)         # (9*Cin_p, RW)

        acc = jnp.dot(w, patch, preferred_element_type=jnp.float32)  # (Cout, RW)
        acc = acc + b
        out = jnp.where(acc >= 0, acc, LEAKY_SLOPE * acc)
        o_ref[n] = out.astype(o_ref.dtype)


def _round_up(x, m):
    return (x + m - 1) // m * m


def _choose_tiling(N, Cin_p, Cout, H, W):
    """Pick (images_per_step, rows_per_block) from a per-step VMEM budget."""
    ITEM = 4
    BATCH_FUSE_BUDGET = 2 * 1024 * 1024    # collapse the batch only when tiny
    VMEM_BUDGET = 12 * 1024 * 1024         # stays under default scoped limits

    def step_bytes(imgs, rows):
        rw = rows * W
        io = 2 * imgs * (Cin_p + Cout) * rw * ITEM                 # dbl-buffered
        tmp = imgs * (20 * Cin_p * rw * 2 + Cout * rw * ITEM)      # ext+taps+patch+acc
        return io + tmp

    # Tiny per-image work: one grid step for as many images as fit (v5e/v6e win).
    if step_bytes(1, H) <= BATCH_FUSE_BUDGET:
        imgs = max(d for d in range(1, N + 1)
                   if N % d == 0 and step_bytes(d, H) <= BATCH_FUSE_BUDGET)
        return imgs, H
    if step_bytes(1, H) <= VMEM_BUDGET:
        return 1, H
    # Large images: row-block spatial tiling with a 1-row halo.
    if H % _SUBLANE == 0:
        legal = [r for r in range(_SUBLANE, H, _SUBLANE)
                 if H % r == 0 and (r * W) % _LANE == 0]
        fitting = [r for r in legal if step_bytes(1, r) <= VMEM_BUDGET]
        if fitting:
            return 1, max(fitting)
        if legal:
            return 1, min(legal)
    # TODO(synk): ragged H (not a multiple of 8) on images too big for VMEM
    # would need masked edge blocks; fall back to whole-image blocks.
    return 1, H


def node_conv_block_forward(t, x_nchw, weight_oihw, bias, *,
                            images_per_step=None, rows_per_block=None,
                            mxu_dtype=jnp.bfloat16):
    """Pallas forward for NodeConvBlock (ndims=2, norm=False).

    Args:
      t: unused (interface parity with the PyTorch module).
      x_nchw: (N, Cin, H, W) float32.
      weight_oihw: (Cout, Cin, 3, 3) float32 (PyTorch conv weight layout).
      bias: (Cout,) float32.
      images_per_step / rows_per_block: optional tiling overrides.
      mxu_dtype: matmul operand dtype (bf16 default; accumulation is f32).
    Returns:
      (N, Cout, H, W) float32.
    """
    del t  # unused by NodeConvBlock.forward
    N, Cin, H, W = x_nchw.shape
    Cout = weight_oihw.shape[0]
    HW = H * W
    Cin_p = _round_up(Cin, _SUBLANE)
    KK = KERNEL * KERNEL

    auto_imgs, auto_rows = _choose_tiling(N, Cin_p, Cout, H, W)
    imgs = images_per_step if images_per_step is not None else auto_imgs
    rows = rows_per_block if rows_per_block is not None else auto_rows
    if N % imgs != 0 or H % rows != 0:
        raise ValueError("images_per_step must divide N and rows_per_block must divide H")
    use_halo = rows < H
    if use_halo:
        if imgs != 1:
            raise ValueError("spatial tiling requires images_per_step == 1")
        if rows % _SUBLANE or H % _SUBLANE or (rows * W) % _LANE:
            raise ValueError("rows_per_block must be a multiple of 8 with rows*W % 128 == 0")

    # Zero-pad Cin to a sublane multiple so every im2col tap is 8-aligned.
    x4d = x_nchw if Cin_p == Cin else jnp.pad(
        x_nchw, ((0, 0), (0, Cin_p - Cin), (0, 0), (0, 0)))
    x_flat = x4d.reshape(N, Cin_p, HW)            # free contiguous reshape

    # Weight -> (Cout, 9*Cin_p), tap-major / channel-minor, bf16 MXU operand.
    w_t = jnp.transpose(weight_oihw, (0, 2, 3, 1))            # (Cout, 3, 3, Cin)
    if Cin_p != Cin:
        w_t = jnp.pad(w_t, ((0, 0), (0, 0), (0, 0), (0, Cin_p - Cin)))
    w_mat = w_t.reshape(Cout, KK * Cin_p).astype(mxu_dtype)
    b_col = bias.reshape(Cout, 1).astype(jnp.float32)

    RW = rows * W
    kernel = functools.partial(_conv3x3_lrelu_kernel, W=W, rows=rows, imgs=imgs,
                               use_halo=use_halo, mxu_dtype=mxu_dtype)

    if use_halo:
        grid = (N, H // rows)
        bands = rows // _SUBLANE
        n_bands = H // _SUBLANE
        in_specs = [
            pl.BlockSpec((1, Cin_p, RW), lambda n, r: (n, 0, r)),
            pl.BlockSpec((1, Cin_p, _SUBLANE, W),
                         lambda n, r: (n, 0, jnp.maximum(r * bands - 1, 0), 0)),
            pl.BlockSpec((1, Cin_p, _SUBLANE, W),
                         lambda n, r: (n, 0, jnp.minimum((r + 1) * bands, n_bands - 1), 0)),
            pl.BlockSpec((Cout, KK * Cin_p), lambda n, r: (0, 0)),
            pl.BlockSpec((Cout, 1), lambda n, r: (0, 0)),
        ]
        out_specs = pl.BlockSpec((1, Cout, RW), lambda n, r: (n, 0, r))
        operands = (x_flat, x4d, x4d, w_mat, b_col)
        semantics = ("parallel", "parallel")
    else:
        grid = (N // imgs,)
        in_specs = [
            pl.BlockSpec((imgs, Cin_p, HW), lambda s: (s, 0, 0)),
            pl.BlockSpec((Cout, KK * Cin_p), lambda s: (0, 0)),
            pl.BlockSpec((Cout, 1), lambda s: (0, 0)),
        ]
        out_specs = pl.BlockSpec((imgs, Cout, HW), lambda s: (s, 0, 0))
        operands = (x_flat, w_mat, b_col)
        semantics = ("parallel",)

    cost = pl.CostEstimate(
        flops=2 * N * HW * KK * Cin_p * Cout,
        transcendentals=0,
        bytes_accessed=(N * Cin_p * HW + Cout * KK * Cin_p + Cout + N * Cout * HW) * 4,
    )

    out_flat = pl.pallas_call(
        kernel,
        out_shape=jax.ShapeDtypeStruct((N, Cout, HW), x_nchw.dtype),
        grid_spec=pltpu.PrefetchScalarGridSpec(
            num_scalar_prefetch=0,
            grid=grid,
            in_specs=in_specs,
            out_specs=out_specs),
        compiler_params=pltpu.CompilerParams(
            dimension_semantics=semantics,
            vmem_limit_bytes=32 * 1024 * 1024),
        cost_estimate=cost,
    )(*operands)

    return out_flat.reshape(N, Cout, H, W)


def init_params(key, in_channels, out_channels):
    """Kaiming-normal weight (fan_in, gain sqrt(2)); zero bias, like the module."""
    fan_in = in_channels * KERNEL * KERNEL
    std = (2.0 ** 0.5) / (fan_in ** 0.5)
    w = std * jax.random.normal(
        key, (out_channels, in_channels, KERNEL, KERNEL), dtype=jnp.float32)
    b = jnp.zeros((out_channels,), dtype=jnp.float32)
    return w, b


def reference_forward(x_nchw, weight_oihw, bias):
    """Pure-JAX reference (sanity check)."""
    out = jax.lax.conv_general_dilated(
        x_nchw, weight_oihw,
        window_strides=(1, 1), padding=((PAD, PAD), (PAD, PAD)),
        dimension_numbers=("NCHW", "OIHW", "NCHW"),
        precision=jax.lax.Precision.HIGHEST)
    out = out + bias.reshape(1, -1, 1, 1)
    return jnp.where(out >= 0, out, LEAKY_SLOPE * out)


if __name__ == "__main__":
    key = jax.random.PRNGKey(0)
    k_x, k_w, k_b = jax.random.split(key, 3)

    N, Cin, Cout, H, W = 2, 4, 8, 16, 16
    x = jax.random.normal(k_x, (N, Cin, H, W), dtype=jnp.float32)
    weight, _ = init_params(k_w, Cin, Cout)
    # Module initializes bias to zero; nonzero here to exercise the bias path.
    bias = 0.1 * jax.random.normal(k_b, (Cout,), dtype=jnp.float32)
    t = jnp.zeros(())   # unused, as in PyTorch

    ref_f32 = reference_forward(x, weight, bias)
    # bf16-operand / f32-accumulate reference (what the MXU computes).
    x_b = x.astype(jnp.bfloat16).astype(jnp.float32)
    w_b = weight.astype(jnp.bfloat16).astype(jnp.float32)
    ref_bf16 = reference_forward(x_b, w_b, bias)

    # 1) Auto tiling: batch collapsed into a single grid step at this size.
    out = jax.block_until_ready(node_conv_block_forward(t, x, weight, bias))
    assert out.shape == (N, Cout, H, W)
    assert jnp.allclose(out, ref_bf16, atol=1e-4, rtol=1e-4), "mismatch (bf16 ref)"
    assert jnp.allclose(out, ref_f32, atol=1e-1, rtol=5e-2), "mismatch (f32 ref)"

    # 2) Row-block spatial tiling path (1-row halo), as used for large images.
    out_t = jax.block_until_ready(
        node_conv_block_forward(t, x, weight, bias,
                                images_per_step=1, rows_per_block=8))
    assert jnp.allclose(out_t, ref_bf16, atol=1e-4, rtol=1e-4), "mismatch (tiled)"

    print("KERNEL_OK")
</pallas_src>

<mosaic_0001>
module attributes {stable_mosaic.version = 11 : i64} {
  func.func @_conv3x3_lrelu_kernel(%arg0: i32, %arg1: memref<2x8x256xf32, #tpu.memory_space<vmem>>, %arg2: memref<8x72xbf16, #tpu.memory_space<vmem>>, %arg3: memref<8x1xf32, #tpu.memory_space<vmem>>, %arg4: memref<2x8x256xf32, #tpu.memory_space<vmem>>) attributes {dimension_semantics = [#tpu.dimension_semantics<parallel>], iteration_bounds = array<i64: 1>, scalar_prefetch = 0 : i64, scratch_operands = 0 : i64, tpu.core_type = #tpu.core_type<tc>, window_params = [{transform_indices = @transform_0, window_bounds = array<i64: 2, 8, 256>}, {pipeline_mode = #tpu.pipeline_mode<synchronous>, transform_indices = @transform_1, window_bounds = array<i64: 8, 72>}, {pipeline_mode = #tpu.pipeline_mode<synchronous>, transform_indices = @transform_2, window_bounds = array<i64: 8, 1>}, {transform_indices = @transform_3, window_bounds = array<i64: 2, 8, 256>}]} {
    %c0 = arith.constant 0 : index
    %c0_0 = arith.constant 0 : index
    %0 = vector.load %arg2[%c0, %c0_0] : memref<8x72xbf16, #tpu.memory_space<vmem>>, vector<8x72xbf16>
    %c0_1 = arith.constant 0 : index
    %c0_2 = arith.constant 0 : index
    %1 = vector.load %arg3[%c0_1, %c0_2] : memref<8x1xf32, #tpu.memory_space<vmem>>, vector<8x1xf32>
    %2 = tpu.iota {dimensions = array<i32: 1>} : vector<1x256xi32>
    %c16_i32 = arith.constant 16 : i32
    %c0_i32 = arith.constant 0 : i32
    %3 = arith.cmpi eq, %c16_i32, %c0_i32 : i32
    %c1_i32 = arith.constant 1 : i32
    %4 = arith.select %3, %c1_i32, %c16_i32 : i32
    %5 = vector.broadcast %4 : i32 to vector<1x256xi32>
    %6 = arith.remsi %2, %5 : vector<1x256xi32>
    %c0_i32_3 = arith.constant 0 : i32
    %7 = vector.broadcast %c0_i32_3 : i32 to vector<1x256xi32>
    %8 = arith.cmpi ne, %6, %7 : vector<1x256xi32>
    %c0_i32_4 = arith.constant 0 : i32
    %9 = vector.broadcast %c0_i32_4 : i32 to vector<1x256xi32>
    %10 = arith.cmpi slt, %6, %9 : vector<1x256xi32>
    %c0_i32_5 = arith.constant 0 : i32
    %11 = arith.cmpi slt, %4, %c0_i32_5 : i32
    %12 = vector.broadcast %11 : i1 to vector<1x256xi1>
    %13 = vector.broadcast %12 : vector<1x256xi1> to vector<1x256xi1>
    %14 = arith.xori %10, %13 : vector<1x256xi1>
    %15 = arith.andi %14, %8 : vector<1x256xi1>
    %16 = vector.broadcast %4 : i32 to vector<1x256xi32>
    %17 = arith.addi %6, %16 : vector<1x256xi32>
    %18 = arith.select %15, %17, %6 : vector<1x256xi1>, vector<1x256xi32>
    %c1_i32_6 = arith.constant 1 : i32
    %19 = vector.broadcast %c1_i32_6 : i32 to vector<1x256xi32>
    %20 = arith.cmpi sge, %18, %19 : vector<1x256xi32>
    %c14_i32 = arith.constant 14 : i32
    %21 = vector.broadcast %c14_i32 : i32 to vector<1x256xi32>
    %22 = arith.cmpi sle, %18, %21 : vector<1x256xi32>
    %cst = arith.constant 0.000000e+00 : bf16
    %23 = vector.broadcast %cst : bf16 to vector<8x16xbf16>
    %cst_7 = arith.constant 0.000000e+00 : bf16
    %24 = vector.broadcast %cst_7 : bf16 to vector<8x1xbf16>
    %c0_8 = arith.constant 0 : index
    %c0_9 = arith.constant 0 : index
    %c0_10 = arith.constant 0 : index
    %25 = vector.load %arg1[%c0_8, %c0_9, %c0_10] : memref<2x8x256xf32, #tpu.memory_space<vmem>>, vector<1x8x256xf32>
    %26 = vector.shape_cast %25 : vector<1x8x256xf32> to vector<8x256xf32>
    %27 = arith.truncf %26 : vector<8x256xf32> to vector<8x256xbf16>
    %28 = tpu.concatenate %24, %23, %27, %23, %24 in 1 : vector<8x1xbf16>, vector<8x16xbf16>, vector<8x256xbf16>, vector<8x16xbf16>, vector<8x1xbf16> -> vector<8x290xbf16>
    %29 = vector.extract_strided_slice %28 {offsets = [0, 0], sizes = [8, 256], strides = [1, 1]} : vector<8x290xbf16> to vector<8x256xbf16>
    %cst_11 = arith.constant 0.000000e+00 : bf16
    %30 = vector.broadcast %cst_11 : bf16 to vector<8x256xbf16>
    %31 = vector.shape_cast %20 : vector<1x256xi1> to vector<1x256xi1>
    %32 = vector.broadcast %31 : vector<1x256xi1> to vector<8x256xi1>
    %33 = arith.select %32, %29, %30 : vector<8x256xi1>, vector<8x256xbf16>
    %34 = vector.extract_strided_slice %28 {offsets = [0, 1], sizes = [8, 256], strides = [1, 1]} : vector<8x290xbf16> to vector<8x256xbf16>
    %35 = vector.extract_strided_slice %28 {offsets = [0, 2], sizes = [8, 256], strides = [1, 1]} : vector<8x290xbf16> to vector<8x256xbf16>
    %cst_12 = arith.constant 0.000000e+00 : bf16
    %36 = vector.broadcast %cst_12 : bf16 to vector<8x256xbf16>
    %37 = vector.shape_cast %22 : vector<1x256xi1> to vector<1x256xi1>
    %38 = vector.broadcast %37 : vector<1x256xi1> to vector<8x256xi1>
    %39 = arith.select %38, %35, %36 : vector<8x256xi1>, vector<8x256xbf16>
    %40 = vector.extract_strided_slice %28 {offsets = [0, 16], sizes = [8, 256], strides = [1, 1]} : vector<8x290xbf16> to vector<8x256xbf16>
    %cst_13 = arith.constant 0.000000e+00 : bf16
    %41 = vector.broadcast %cst_13 : bf16 to vector<8x256xbf16>
    %42 = vector.shape_cast %20 : vector<1x256xi1> to vector<1x256xi1>
    %43 = vector.broadcast %42 : vector<1x256xi1> to vector<8x256xi1>
    %44 = arith.select %43, %40, %41 : vector<8x256xi1>, vector<8x256xbf16>
    %45 = vector.extract_strided_slice %28 {offsets = [0, 17], sizes = [8, 256], strides = [1, 1]} : vector<8x290xbf16> to vector<8x256xbf16>
    %46 = vector.extract_strided_slice %28 {offsets = [0, 18], sizes = [8, 256], strides = [1, 1]} : vector<8x290xbf16> to vector<8x256xbf16>
    %cst_14 = arith.constant 0.000000e+00 : bf16
    %47 = vector.broadcast %cst_14 : bf16 to vector<8x256xbf16>
    %48 = vector.shape_cast %22 : vector<1x256xi1> to vector<1x256xi1>
    %49 = vector.broadcast %48 : vector<1x256xi1> to vector<8x256xi1>
    %50 = arith.select %49, %46, %47 : vector<8x256xi1>, vector<8x256xbf16>
    %51 = vector.extract_strided_slice %28 {offsets = [0, 32], sizes = [8, 256], strides = [1, 1]} : vector<8x290xbf16> to vector<8x256xbf16>
    %cst_15 = arith.constant 0.000000e+00 : bf16
    %52 = vector.broadcast %cst_15 : bf16 to vector<8x256xbf16>
    %53 = vector.shape_cast %20 : vector<1x256xi1> to vector<1x256xi1>
    %54 = vector.broadcast %53 : vector<1x256xi1> to vector<8x256xi1>
    %55 = arith.select %54, %51, %52 : vector<8x256xi1>, vector<8x256xbf16>
    %56 = vector.extract_strided_slice %28 {offsets = [0, 33], sizes = [8, 256], strides = [1, 1]} : vector<8x290xbf16> to vector<8x256xbf16>
    %57 = vector.extract_strided_slice %28 {offsets = [0, 34], sizes = [8, 256], strides = [1, 1]} : vector<8x290xbf16> to vector<8x256xbf16>
    %cst_16 = arith.constant 0.000000e+00 : bf16
    %58 = vector.broadcast %cst_16 : bf16 to vector<8x256xbf16>
    %59 = vector.shape_cast %22 : vector<1x256xi1> to vector<1x256xi1>
    %60 = vector.broadcast %59 : vector<1x256xi1> to vector<8x256xi1>
    %61 = arith.select %60, %57, %58 : vector<8x256xi1>, vector<8x256xbf16>
    %62 = tpu.concatenate %33, %34, %39, %44, %45, %50, %55, %56, %61 in 0 : vector<8x256xbf16>, vector<8x256xbf16>, vector<8x256xbf16>, vector<8x256xbf16>, vector<8x256xbf16>, vector<8x256xbf16>, vector<8x256xbf16>, vector<8x256xbf16>, vector<8x256xbf16> -> vector<72x256xbf16>
    %cst_17 = arith.constant dense<0.000000e+00> : vector<8x256xf32>
    %63 = tpu.matmul %0, %62, %cst_17 {dimension_numbers = #tpu.dot_dimension_numbers<[1], [0], [0], [1], [0, 0, 1, 1], [], []>} : vector<8x72xbf16>, vector<72x256xbf16>, vector<8x256xf32> -> vector<8x256xf32>
    %64 = vector.broadcast %1 : vector<8x1xf32> to vector<8x256xf32>
    %65 = arith.addf %63, %64 : vector<8x256xf32>
    %cst_18 = arith.constant 0.000000e+00 : f32
    %66 = vector.broadcast %cst_18 : f32 to vector<8x256xf32>
    %67 = arith.cmpf oge, %65, %66 : vector<8x256xf32>
    %cst_19 = arith.constant 2.000000e-01 : f32
    %68 = vector.broadcast %cst_19 : f32 to vector<8x256xf32>
    %69 = arith.mulf %68, %65 : vector<8x256xf32>
    %70 = arith.select %67, %65, %69 : vector<8x256xi1>, vector<8x256xf32>
    %c0_20 = arith.constant 0 : index
    %c0_21 = arith.constant 0 : index
    %c0_22 = arith.constant 0 : index
    %71 = vector.load %arg4[%c0_20, %c0_21, %c0_22] : memref<2x8x256xf32, #tpu.memory_space<vmem>>, vector<1x8x256xf32>
    %72 = vector.shape_cast %71 : vector<1x8x256xf32> to vector<8x256xf32>
    %73 = vector.shape_cast %70 : vector<8x256xf32> to vector<1x8x256xf32>
    tpu.vector_store %arg4[%c0_20, %c0_21, %c0_22], %73 {strides = array<i32>} : memref<2x8x256xf32, #tpu.memory_space<vmem>>, vector<1x8x256xf32>,
    %c1 = arith.constant 1 : index
    %c0_23 = arith.constant 0 : index
    %c0_24 = arith.constant 0 : index
    %74 = vector.load %arg1[%c1, %c0_23, %c0_24] : memref<2x8x256xf32, #tpu.memory_space<vmem>>, vector<1x8x256xf32>
    %75 = vector.shape_cast %74 : vector<1x8x256xf32> to vector<8x256xf32>
    %76 = arith.truncf %75 : vector<8x256xf32> to vector<8x256xbf16>
    %77 = tpu.concatenate %24, %23, %76, %23, %24 in 1 : vector<8x1xbf16>, vector<8x16xbf16>, vector<8x256xbf16>, vector<8x16xbf16>, vector<8x1xbf16> -> vector<8x290xbf16>
    %78 = vector.extract_strided_slice %77 {offsets = [0, 0], sizes = [8, 256], strides = [1, 1]} : vector<8x290xbf16> to vector<8x256xbf16>
    %cst_25 = arith.constant 0.000000e+00 : bf16
    %79 = vector.broadcast %cst_25 : bf16 to vector<8x256xbf16>
    %80 = vector.shape_cast %20 : vector<1x256xi1> to vector<1x256xi1>
    %81 = vector.broadcast %80 : vector<1x256xi1> to vector<8x256xi1>
    %82 = arith.select %81, %78, %79 : vector<8x256xi1>, vector<8x256xbf16>
    %83 = vector.extract_strided_slice %77 {offsets = [0, 1], sizes = [8, 256], strides = [1, 1]} : vector<8x290xbf16> to vector<8x256xbf16>
    %84 = vector.extract_strided_slice %77 {offsets = [0, 2], sizes = [8, 256], strides = [1, 1]} : vector<8x290xbf16> to vector<8x256xbf16>
    %cst_26 = arith.constant 0.000000e+00 : bf16
    %85 = vector.broadcast %cst_26 : bf16 to vector<8x256xbf16>
    %86 = vector.shape_cast %22 : vector<1x256xi1> to vector<1x256xi1>
    %87 = vector.broadcast %86 : vector<1x256xi1> to vector<8x256xi1>
    %88 = arith.select %87, %84, %85 : vector<8x256xi1>, vector<8x256xbf16>
    %89 = vector.extract_strided_slice %77 {offsets = [0, 16], sizes = [8, 256], strides = [1, 1]} : vector<8x290xbf16> to vector<8x256xbf16>
    %cst_27 = arith.constant 0.000000e+00 : bf16
    %90 = vector.broadcast %cst_27 : bf16 to vector<8x256xbf16>
    %91 = vector.shape_cast %20 : vector<1x256xi1> to vector<1x256xi1>
    %92 = vector.broadcast %91 : vector<1x256xi1> to vector<8x256xi1>
    %93 = arith.select %92, %89, %90 : vector<8x256xi1>, vector<8x256xbf16>
    %94 = vector.extract_strided_slice %77 {offsets = [0, 17], sizes = [8, 256], strides = [1, 1]} : vector<8x290xbf16> to vector<8x256xbf16>
    %95 = vector.extract_strided_slice %77 {offsets = [0, 18], sizes = [8, 256], strides = [1, 1]} : vector<8x290xbf16> to vector<8x256xbf16>
    %cst_28 = arith.constant 0.000000e+00 : bf16
    %96 = vector.broadcast %cst_28 : bf16 to vector<8x256xbf16>
    %97 = vector.shape_cast %22 : vector<1x256xi1> to vector<1x256xi1>
    %98 = vector.broadcast %97 : vector<1x256xi1> to vector<8x256xi1>
    %99 = arith.select %98, %95, %96 : vector<8x256xi1>, vector<8x256xbf16>
    %100 = vector.extract_strided_slice %77 {offsets = [0, 32], sizes = [8, 256], strides = [1, 1]} : vector<8x290xbf16> to vector<8x256xbf16>
    %cst_29 = arith.constant 0.000000e+00 : bf16
    %101 = vector.broadcast %cst_29 : bf16 to vector<8x256xbf16>
    %102 = vector.shape_cast %20 : vector<1x256xi1> to vector<1x256xi1>
    %103 = vector.broadcast %102 : vector<1x256xi1> to vector<8x256xi1>
    %104 = arith.select %103, %100, %101 : vector<8x256xi1>, vector<8x256xbf16>
    %105 = vector.extract_strided_slice %77 {offsets = [0, 33], sizes = [8, 256], strides = [1, 1]} : vector<8x290xbf16> to vector<8x256xbf16>
    %106 = vector.extract_strided_slice %77 {offsets = [0, 34], sizes = [8, 256], strides = [1, 1]} : vector<8x290xbf16> to vector<8x256xbf16>
    %cst_30 = arith.constant 0.000000e+00 : bf16
    %107 = vector.broadcast %cst_30 : bf16 to vector<8x256xbf16>
    %108 = vector.shape_cast %22 : vector<1x256xi1> to vector<1x256xi1>
    %109 = vector.broadcast %108 : vector<1x256xi1> to vector<8x256xi1>
    %110 = arith.select %109, %106, %107 : vector<8x256xi1>, vector<8x256xbf16>
    %111 = tpu.concatenate %82, %83, %88, %93, %94, %99, %104, %105, %110 in 0 : vector<8x256xbf16>, vector<8x256xbf16>, vector<8x256xbf16>, vector<8x256xbf16>, vector<8x256xbf16>, vector<8x256xbf16>, vector<8x256xbf16>, vector<8x256xbf16>, vector<8x256xbf16> -> vector<72x256xbf16>
    %cst_31 = arith.constant dense<0.000000e+00> : vector<8x256xf32>
    %112 = tpu.matmul %0, %111, %cst_31 {dimension_numbers = #tpu.dot_dimension_numbers<[1], [0], [0], [1], [0, 0, 1, 1], [], []>} : vector<8x72xbf16>, vector<72x256xbf16>, vector<8x256xf32> -> vector<8x256xf32>
    %113 = vector.broadcast %1 : vector<8x1xf32> to vector<8x256xf32>
    %114 = arith.addf %112, %113 : vector<8x256xf32>
    %cst_32 = arith.constant 0.000000e+00 : f32
    %115 = vector.broadcast %cst_32 : f32 to vector<8x256xf32>
    %116 = arith.cmpf oge, %114, %115 : vector<8x256xf32>
    %cst_33 = arith.constant 2.000000e-01 : f32
    %117 = vector.broadcast %cst_33 : f32 to vector<8x256xf32>
    %118 = arith.mulf %117, %114 : vector<8x256xf32>
    %119 = arith.select %116, %114, %118 : vector<8x256xi1>, vector<8x256xf32>
    %c1_34 = arith.constant 1 : index
    %c0_35 = arith.constant 0 : index
    %c0_36 = arith.constant 0 : index
    %120 = vector.load %arg4[%c1_34, %c0_35, %c0_36] : memref<2x8x256xf32, #tpu.memory_space<vmem>>, vector<1x8x256xf32>
    %121 = vector.shape_cast %120 : vector<1x8x256xf32> to vector<8x256xf32>
    %122 = vector.shape_cast %119 : vector<8x256xf32> to vector<1x8x256xf32>
    tpu.vector_store %arg4[%c1_34, %c0_35, %c0_36], %122 {strides = array<i32>} : memref<2x8x256xf32, #tpu.memory_space<vmem>>, vector<1x8x256xf32>,
    return
  }
  func.func @transform_0(%arg0: i32) -> (i32, i32, i32) {
    %c0_i32 = arith.constant 0 : i32
    %c0_i32_0 = arith.constant 0 : i32
    %c0_i32_1 = arith.constant 0 : i32
    return %arg0, %c0_i32, %c0_i32_0 : i32, i32, i32
  }
  func.func @transform_1(%arg0: i32) -> (i32, i32) {
    %c0_i32 = arith.constant 0 : i32
    %c0_i32_0 = arith.constant 0 : i32
    %c0_i32_1 = arith.constant 0 : i32
    return %c0_i32, %c0_i32_0 : i32, i32
  }
  func.func @transform_2(%arg0: i32) -> (i32, i32) {
    %c0_i32 = arith.constant 0 : i32
    %c0_i32_0 = arith.constant 0 : i32
    %c0_i32_1 = arith.constant 0 : i32
    return %c0_i32, %c0_i32_0 : i32, i32
  }
  func.func @transform_3(%arg0: i32) -> (i32, i32, i32) {
    %c0_i32 = arith.constant 0 : i32
    %c0_i32_0 = arith.constant 0 : i32
    %c0_i32_1 = arith.constant 0 : i32
    return %arg0, %c0_i32, %c0_i32_0 : i32, i32, i32
  }
}

</mosaic_0001>

<bundles_post_ra>
// kernel: tpu_custom_call.1
= control target key start
LH: loop header
LB: loop body
LE: loop exit
PB: predicated region body
PF: predicated region fallthrough
CT: control target
= control target key end

     0   :  { %8 = vsyncpa [#allocation3], 0  ;;  %s953_s0 = inlined_call_operand.hbm [shape: f32[2,8,256], index: 0, kind: input, shape index: {}]   ;;  %s954_s1 = inlined_call_operand.vmem [shape: bf16[8,72], index: 1, kind: input, shape index: {}]   ;;  %s955_s2 = inlined_call_operand.vmem [shape: f32[8,1], index: 2, kind: input, shape index: {}]   ;;  %s956_s3 = inlined_call_operand.hbm [shape: f32[2,8,256], index: 3, kind: output, shape index: {}]  }
   0x1   :  { %9 = vsyncpa [#allocation4], 0  ;;  %s674_s12 = smov [#allocation2]  }
   0x2   :  { %s15_s13 = sshll.u32 %s674_s12, 4  ;;  %s16_s13 = int_to_ptr.vmem [resolvable:$true] %s15_s13 }
   0x3   :  { %s638_s14 = scalar_lea.vmem %s16_s13, 512  ;;  %p643_p1 = scmp.lt.s32.totalorder %s16_s13, %s16_s13 }
   0x4   :  { %p639_p0 = scmp.ne.s32.totalorder %s16_s13, %s638_s14  ;;  %p644_p2 = scmp.lt.s32.totalorder %s638_s14, %s638_s14 }
   0x6   :  { %p645_p3 = por %p644_p2, %p643_p1 }
   0x8   :  { %p646_p4 = pnand %p645_p3, %p639_p0 }
   0xa   :  { %649 = shalt.err (!%p646_p4)
}
   0xb   :  { %s675_s15 = smov 256   ;;  %s676_s16 = smov 16  }
   0xc   :  { %21 = dma.hbm_to_vmem [thread:$0]  %s953_s0, 512, %s16_s13, [#allocation3], %s675_s15, %s675_s15, %s676_s16  }
   0xd   :  { %670 = dma.done.wait [#allocation3], 512  }
   0xe   :  { %671 = vsyncadd [#allocation3], 4294966784  ;;  %v34_v0 = vlaneseq  ;;  %v677_v1 = vmov 0   ;;  %v377_v8 = vld [vmem:[#allocation2 + $0x18] sm:$0xff]  ;;  %v66_v9 = vld [vmem:[#allocation2 + $0x8] sm:$0xff]  ;;  %s678_s0 = smov 17  }
   0xf   :  { %572 = vmatprep.mubr.bf16.mxu1 %v677_v1  ;;  %358 = vmatprep.mubr.bf16.mxu0 %v677_v1  ;;  %v376_v10 = vld [vmem:[#allocation2 + $0x10] sm:$0xff]  ;;  %v379_v11 = vpack.c.bf16 %v377_v8, %v377_v8  ;;  %v68_v12 = vpack.c.bf16 %v66_v9, %v66_v9  ;;  %v65_v13 = vld [vmem:[#allocation2] sm:$0xff]  ;;  %s679_s19 = smov 34   ;;  %s680_s20 = smov 32   ;;  %vm75_vm6 = vcmask 138240   ;;  %vm85_vm7 = vcmask 269312  }
  0x10   :  { %v35_v2 = vand.u32 127, %v34_v0  ;;  %629 = vset.pattern.permute.xlu0 %v677_v1  ;;  %v95_v7 = vshrl.u32 %v34_v0, 7  ;;  %v378_v15 = vpack.c.bf16 %v376_v10, %v376_v10  ;;  %v67_v16 = vpack.c.bf16 %v65_v13, %v65_v13  ;;  %s681_s21 = smov 18   ;;  %s682_s22 = smov 2  }
  0x11   :  { %384 = vrot.lane.b32.xlu1 %v379_v11, %s678_s0  ;;  %73 = vrot.lane.b32.xlu0 %v68_v12, %s678_s0  ;;  %s683_s23 = smov 111   ;;  %s684_s24 = smov 95   ;;  %vm172_vm15 = vcmask 277504  }
  0x12   :  { %v36_v3 = vadd.s32 128, %v35_v2  ;;  %v41_v4 = vand.u32 15, %v35_v2  ;;  %v100_v17 = vsub.s32 4, %v95_v7  ;;  %v96_v18 = vsub.s32 0, %v95_v7  ;;  %s685_s25 = smov 127   ;;  %s686_s26 = smov 94  }
  0x13   :  { %s687_s27 = smov 96   ;;  %s688_s28 = smov 126  }
  0x14   :  { %v48_v5 = vand.u32 15, %v36_v3  ;;  %vm718_vm0 = vcmp.le.s32.totalorder %v41_v4, 14  ;;  %vm724_vm3 = vcmp.ge.s32.totalorder %v41_v4, 1  ;;  %s689_s29 = smov 110   ;;  %s690_s30 = smov 112  }
  0x15   :  { %382 = vrot.lane.b32.xlu1 %v378_v15, %s678_s0  ;;  %71 = vrot.lane.b32.xlu0 %v67_v16, %s678_s0 }
  0x16   :  { %vm64_vm1 = vcmp.le.s32.totalorder %v48_v5, 14  ;;  %vm62_vm4 = vcmp.ge.s32.totalorder %v48_v5, 1 }
  0x17   :  { %vm110_vm2 = vmpackc.low %vm64_vm1, %vm718_vm0 }
  0x18   :  { %v111_v19 = vsel %vm110_vm2, 65537, %v677_v1  ;;  %vm92_vm5 = vmpackc.low %vm62_vm4, %vm724_vm3  ;;  %vm160_vm3 = vcmask 261120  }
  0x19   :  { %v119_v20 = vrot.slane %v111_v19, %v100_v17  ;;  %v115_v21 = vrot.slane %v111_v19, %v96_v18  ;;  %v93_v22 = vsel %vm92_vm5, 65537, %v677_v1 }
  0x1a   :  { %v101_v23 = vrot.slane %v93_v22, %v100_v17  ;;  %v97_v24 = vrot.slane %v93_v22, %v96_v18 }
  0x1b   :  { %170 = vrot.lane.b32.xlu1 %v119_v20, %s679_s19  ;;  %168 = vrot.lane.b32.xlu0 %v115_v21, %s679_s19 }
  0x1c   :  { %vm103_vm8 = vcmp.ne.s16.totalorder %v101_v23, 0  ;;  %vm102_vm9 = vcmp.ne.s16.totalorder %v97_v24, 0 }
  0x1f   :  { %158 = vrot.lane.b32.xlu1 %v101_v23, %s680_s20  ;;  %156 = vrot.lane.b32.xlu0 %v97_v24, %s680_s20 }
  0x23   :  { %146 = vrot.lane.b32.xlu1 %v119_v20, %s681_s21  ;;  %144 = vrot.lane.b32.xlu0 %v115_v21, %s681_s21 }
  0x27   :  { %134 = vrot.lane.b32.xlu1 %v101_v23, %s676_s16  ;;  %132 = vrot.lane.b32.xlu0 %v97_v24, %s676_s16 }
  0x2b   :  { %122 = vrot.lane.b32.xlu1 %v119_v20, %s682_s22  ;;  %120 = vrot.lane.b32.xlu0 %v115_v21, %s682_s22 }
  0x83   :  { %v385_v25 = vpop.permute.xlu1 %384  ;;  %v74_v26 = vpop.permute.xlu0 %73 }
  0x84   :  { %v392_v27 = vsel %vm75_vm6, %v385_v25, 0  ;;  %v84_v28 = vsel %vm75_vm6, %v74_v26, 0 }
  0x85   :  { %v734_v29 = vsel %vm85_vm7, %v84_v28, 0  ;;  %v737_v30 = vsel %vm85_vm7, %v392_v27, 0  ;;  %vm148_vm7 = vcmask 146432  }
  0x86   :  { %225 = vrot.lane.b32.xlu1 %v734_v29, %s683_s23  ;;  %v184_v44 = vrot.slane %v734_v29, 4  ;;  %v416_v47 = vrot.slane %v737_v30, 4 }
  0x87   :  { %v383_v31 = vpop.permute.xlu1 %382  ;;  %v72_v32 = vpop.permute.xlu0 %71 }
  0x88   :  { %v740_v33 = vsel %vm75_vm6, %v383_v31, %v385_v25  ;;  %v743_v34 = vsel %vm75_vm6, 0, %v383_v31  ;;  %v746_v35 = vsel %vm75_vm6, %v72_v32, %v74_v26  ;;  %v749_v36 = vsel %vm75_vm6, 0, %v72_v32 }
  0x89   :  { %223 = vrot.lane.b32.xlu0 %v746_v35, %s683_s23  ;;  %v754_v37 = vsel %vm103_vm8, %v746_v35, 0  ;;  %v757_v38 = vsel %vm103_vm8, %v740_v33, 0  ;;  %v760_v39 = vsel %vm102_vm9, %v743_v34, 0  ;;  %v763_v40 = vsel %vm102_vm9, %v749_v36, 0 }
  0x8a   :  { %454 = vrot.lane.b32.xlu1 %v737_v30, %s683_s23  ;;  %v182_v41 = vrot.slane %v749_v36, 4  ;;  %v414_v42 = vrot.slane %v743_v34, 4  ;;  %v183_v46 = vrot.slane %v746_v35, 4  ;;  %v415_v49 = vrot.slane %v740_v33, 4 }
  0x8b   :  { %vm124_vm6 = vcmask 15360  }
  0x8d   :  { %452 = vrot.lane.b32.xlu0 %v740_v33, %s683_s23  ;;  %v171_v43 = vpop.permute.xlu1 %170  ;;  %v169_v45 = vpop.permute.xlu0 %168 }
  0x8e   :  { %257 = vrot.lane.b32.xlu1 %v182_v41, %s684_s24  ;;  %vm174_vm10 = vcmp.ne.s16.totalorder %v169_v45, 0  ;;  %vm176_vm11 = vcmp.ne.s16.totalorder %v171_v43, 0  ;;  %v173_v2 = vsel %vm172_vm15, %v169_v45, %v171_v43  ;;  %vm275_vm15 = vcmask 769024  }
  0x8f   :  { %v409_v52 = vsel %vm174_vm10, %v743_v34, 0  ;;  %v177_v54 = vsel %vm174_vm10, %v749_v36, 0  ;;  %v411_v56 = vsel %vm176_vm11, %v737_v30, 0  ;;  %v179_v58 = vsel %vm176_vm11, %v734_v29, 0 }
  0x90   :  { %vm175_vm1 = vcmp.ne.s16.totalorder %v173_v2, 0  ;;  %vm136_vm11 = vcmask 130048  }
  0x91   :  { %221 = vrot.lane.b32.xlu0 %v749_v36, %s683_s23  ;;  %v159_v48 = vpop.permute.xlu1 %158  ;;  %v157_v50 = vpop.permute.xlu0 %156  ;;  %v178_v7 = vsel %vm175_vm1, %v746_v35, 0  ;;  %v410_v10 = vsel %vm175_vm1, %v740_v33, 0  ;;  %vm263_vm1 = vcmask 777216  }
  0x92   :  { %483 = vrot.lane.b32.xlu1 %v414_v42, %s684_s24  ;;  %vm164_vm12 = vcmp.ne.s16.totalorder %v159_v48, 0  ;;  %vm162_vm13 = vcmp.ne.s16.totalorder %v157_v50, 0  ;;  %v161_v8 = vsel %vm160_vm3, %v157_v50, %v159_v48  ;;  %vm242_vm3 = vcmask 900096  }
  0x93   :  { %v167_v59 = vsel %vm164_vm12, %v734_v29, 0  ;;  %v165_v61 = vsel %vm162_vm13, %v749_v36, 0  ;;  %v408_v62 = vsel %vm164_vm12, %v737_v30, 0  ;;  %v406_v0 = vsel %vm162_vm13, %v743_v34, 0 }
  0x94   :  { %vm163_vm4 = vcmp.ne.s16.totalorder %v161_v8, 0 }
  0x95   :  { %450 = vrot.lane.b32.xlu0 %v743_v34, %s683_s23  ;;  %v783_v51 = vpop.permute.xlu1 %146  ;;  %v787_v53 = vpop.permute.xlu0 %144  ;;  %v166_v13 = vsel %vm163_vm4, %v746_v35, 0  ;;  %v407_v17 = vsel %vm163_vm4, %v740_v33, 0  ;;  %vm191_vm4 = vcmask 1039360  }
  0x96   :  { %261 = vrot.lane.b32.xlu1 %v184_v44, %s684_s24  ;;  %vm152_vm2 = vcmp.ne.s16.totalorder %v783_v51, 0  ;;  %vm150_vm5 = vcmp.ne.s16.totalorder %v787_v53, 0  ;;  %v149_v19 = vsel %vm148_vm7, %v787_v53, %v783_v51  ;;  %vm316_vm7 = vcmask 588800  }
  0x97   :  { %v155_v6 = vsel %vm152_vm2, %v734_v29, 0  ;;  %v405_v11 = vsel %vm152_vm2, %v737_v30, 0  ;;  %v153_v14 = vsel %vm150_vm5, %v749_v36, 0  ;;  %v403_v18 = vsel %vm150_vm5, %v743_v34, 0 }
  0x98   :  { %v235_v9 = vrot.slane %v155_v6, 4  ;;  %v463_v12 = vrot.slane %v405_v11, 4  ;;  %v233_v16 = vrot.slane %v153_v14, 4  ;;  %v461_v20 = vrot.slane %v403_v18, 4 }
  0x99   :  { %259 = vrot.lane.b32.xlu0 %v183_v46, %s684_s24  ;;  %v791_v55 = vpop.permute.xlu1 %134  ;;  %v796_v57 = vpop.permute.xlu0 %132  ;;  %vm151_vm10 = vcmp.ne.s16.totalorder %v149_v19, 0  ;;  %vm254_vm2 = vcmask 785408   ;;  %vm203_vm5 = vcmask 1031168  }
  0x9a   :  { %487 = vrot.lane.b32.xlu1 %v416_v47, %s684_s24  ;;  %vm140_vm9 = vcmp.ne.s16.totalorder %v791_v55, 0  ;;  %v154_v23 = vsel %vm151_vm10, %v746_v35, 0  ;;  %v137_v27 = vsel %vm136_vm11, %v796_v57, %v791_v55  ;;  %vm138_vm12 = vcmp.ne.s16.totalorder %v796_v57, 0 }
  0x9b   :  { %v143_v22 = vsel %vm140_vm9, %v734_v29, 0  ;;  %v402_v26 = vsel %vm140_vm9, %v737_v30, 0  ;;  %v234_v28 = vrot.slane %v154_v23, 4  ;;  %vm139_vm13 = vcmp.ne.s16.totalorder %v137_v27, 0 }
  0x9c   :  { %v211_v24 = vrot.slane %v143_v22, 4  ;;  %v441_v31 = vrot.slane %v402_v26, 4  ;;  %v141_v32 = vsel %vm138_vm12, %v749_v36, 0  ;;  %v401_v50 = vsel %vm139_vm13, %v740_v33, 0 }
  0x9d   :  { %485 = vrot.lane.b32.xlu0 %v415_v49, %s684_s24  ;;  %v123_v60 = vpop.permute.xlu1 %122  ;;  %v121_v63 = vpop.permute.xlu0 %120  ;;  %v209_v45 = vrot.slane %v141_v32, 4 }
  0x9e   :  { %189 = vrot.lane.b32.xlu1 %v184_v44, %s685_s25  ;;  %vm128_vm14 = vcmp.ne.s16.totalorder %v123_v60, 0  ;;  %vm126_vm0 = vcmp.ne.s16.totalorder %v121_v63, 0  ;;  %v125_v15 = vsel %vm124_vm6, %v121_v63, %v123_v60  ;;  %v142_v44 = vsel %vm139_vm13, %v746_v35, 0 }
  0x9f   :  { %v131_v1 = vsel %vm128_vm14, %v734_v29, 0  ;;  %v129_v3 = vsel %vm126_vm0, %v749_v36, 0  ;;  %v399_v4 = vsel %vm128_vm14, %v737_v30, 0  ;;  %v397_v5 = vsel %vm126_vm0, %v743_v34, 0 }
  0xa0   :  { %vm127_vm8 = vcmp.ne.s16.totalorder %v125_v15, 0  ;;  %v404_v29 = vsel %vm151_vm10, %v740_v33, 0  ;;  %v210_v48 = vrot.slane %v142_v44, 4  ;;  %vm227_vm14 = vcmask 908288  }
  0xa1   :  { %187 = vrot.lane.b32.xlu0 %v183_v46, %s685_s25  ;;  %v130_v21 = vsel %vm127_vm8, %v746_v35, 0  ;;  %v398_v25 = vsel %vm127_vm8, %v740_v33, 0  ;;  %v462_v43 = vrot.slane %v404_v29, 4  ;;  %v400_v46 = vsel %vm138_vm12, %v743_v34, 0  ;;  %v33_v35 = vld [vmem:[%s955_s2] sm:$0xff] }
  0xa2   :  { %494 = vrot.lane.b32.xlu1 %v409_v52, %s686_s26  ;;  %v439_v51 = vrot.slane %v400_v46, 4  ;;  %v440_v52 = vrot.slane %v401_v50, 4  ;;  %vm278_vm0 = vcmask 1043456   ;;  %vm218_vm6 = vcmask 916480  }
  0xa5   :  { %269 = vrot.lane.b32.xlu0 %v177_v54, %s686_s26 }
  0xa6   :  { %498 = vrot.lane.b32.xlu1 %v411_v56, %s686_s26 }
  0xa9   :  { %273 = vrot.lane.b32.xlu0 %v179_v58, %s686_s26 }
  0xaa   :  { %252 = vrot.lane.b32.xlu1 %v167_v59, %s687_s27 }
  0xad   :  { %248 = vrot.lane.b32.xlu0 %v165_v61, %s687_s27 }
  0xae   :  { %479 = vrot.lane.b32.xlu1 %v408_v62, %s687_s27 }
  0xb1   :  { %475 = vrot.lane.b32.xlu0 %v406_v0, %s687_s27 }
  0xb2   :  { %201 = vrot.lane.b32.xlu1 %v131_v1, %s688_s28 }
  0xb5   :  { %197 = vrot.lane.b32.xlu0 %v129_v3, %s688_s28 }
  0xb6   :  { %432 = vrot.lane.b32.xlu1 %v399_v4, %s688_s28 }
  0xb9   :  { %428 = vrot.lane.b32.xlu0 %v397_v5, %s688_s28 }
  0xba   :  { %271 = vrot.lane.b32.xlu1 %v178_v7, %s686_s26 }
  0xbd   :  { %496 = vrot.lane.b32.xlu0 %v410_v10, %s686_s26 }
  0xbe   :  { %240 = vrot.lane.b32.xlu1 %v235_v9, %s689_s29 }
  0xc1   :  { %250 = vrot.lane.b32.xlu0 %v166_v13, %s687_s27 }
  0xc2   :  { %468 = vrot.lane.b32.xlu1 %v463_v12, %s689_s29 }
  0xc5   :  { %477 = vrot.lane.b32.xlu0 %v407_v17, %s687_s27 }
  0xc6   :  { %236 = vrot.lane.b32.xlu1 %v233_v16, %s689_s29 }
  0xc9   :  { %199 = vrot.lane.b32.xlu0 %v130_v21, %s688_s28 }
  0xca   :  { %464 = vrot.lane.b32.xlu1 %v461_v20, %s689_s29 }
  0xcd   :  { %430 = vrot.lane.b32.xlu0 %v398_v25, %s688_s28 }
  0xce   :  { %216 = vrot.lane.b32.xlu1 %v211_v24, %s690_s30 }
  0xd1   :  { %238 = vrot.lane.b32.xlu0 %v234_v28, %s689_s29 }
  0xd2   :  { %446 = vrot.lane.b32.xlu1 %v441_v31, %s690_s30 }
  0xd5   :  { %466 = vrot.lane.b32.xlu0 %v462_v43, %s689_s29 }
  0xd6   :  { %212 = vrot.lane.b32.xlu1 %v209_v45, %s690_s30 }
  0xd9   :  { %214 = vrot.lane.b32.xlu0 %v210_v48, %s690_s30 }
  0xda   :  { %442 = vrot.lane.b32.xlu1 %v439_v51, %s690_s30 }
  0xdd   :  { %444 = vrot.lane.b32.xlu0 %v440_v52, %s690_s30 }
  0xde   :  { %421 = vrot.lane.b32.xlu1 %v416_v47, %s685_s25 }
  0xe1   :  { %419 = vrot.lane.b32.xlu0 %v415_v49, %s685_s25 }
  0xe2   :  { %417 = vrot.lane.b32.xlu1 %v414_v42, %s685_s25 }
  0xe5   :  { %185 = vrot.lane.b32.xlu0 %v182_v41, %s685_s25 }
  0xe9   :  { %313 = vperm.xlu0 %629, %v33_v35  }
  0xf8   :  { %v226_v53 = vpop.permute.xlu1 %225 }
  0xfb   :  { %v224_v30 = vpop.permute.xlu0 %223 }
  0xfc   :  { %v869_v47 = vsel %vm227_vm14, %v224_v30, %v226_v53  ;;  %v455_v33 = vpop.permute.xlu1 %454 }
  0xff   :  { %v453_v49 = vpop.permute.xlu0 %452 }
 0x100   :  { %v871_v54 = vsel %vm227_vm14, %v453_v49, %v455_v33  ;;  %v258_v34 = vpop.permute.xlu1 %257 }
 0x103   :  { %v222_v42 = vpop.permute.xlu0 %221 }
 0x104   :  { %v873_v55 = vsel %vm227_vm14, %v222_v42, %v224_v30  ;;  %v484_v36 = vpop.permute.xlu1 %483 }
 0x107   :  { %v451_v41 = vpop.permute.xlu0 %450 }
 0x108   :  { %v875_v56 = vsel %vm227_vm14, %v451_v41, %v453_v49  ;;  %v262_v57 = vpop.permute.xlu1 %261 }
 0x10b   :  { %v260_v58 = vpop.permute.xlu0 %259 }
 0x10c   :  { %v488_v59 = vpop.permute.xlu1 %487  ;;  %v264_v21 = vsel %vm263_vm1, %v258_v34, %v260_v58  ;;  %v265_v22 = vsel %vm263_vm1, %v260_v58, %v262_v57 }
 0x10f   :  { %v486_v60 = vpop.permute.xlu0 %485 }
 0x110   :  { %v877_v61 = vpop.permute.xlu1 %189  ;;  %v489_v29 = vsel %vm263_vm1, %v484_v36, %v486_v60  ;;  %v490_v31 = vsel %vm263_vm1, %v486_v60, %v488_v59 }
 0x113   :  { %v879_v62 = vpop.permute.xlu0 %187 }
 0x114   :  { %v495_v63 = vpop.permute.xlu1 %494 }
 0x117   :  { %v270_v0 = vpop.permute.xlu0 %269 }
 0x118   :  { %v499_v1 = vpop.permute.xlu1 %498 }
 0x11b   :  { %v274_v2 = vpop.permute.xlu0 %273 }
 0x11c   :  { %v253_v3 = vpop.permute.xlu1 %252 }
 0x11f   :  { %v249_v4 = vpop.permute.xlu0 %248 }
 0x120   :  { %v480_v5 = vpop.permute.xlu1 %479 }
 0x123   :  { %v476_v6 = vpop.permute.xlu0 %475 }
 0x124   :  { %v881_v7 = vpop.permute.xlu1 %201 }
 0x127   :  { %v883_v8 = vpop.permute.xlu0 %197 }
 0x128   :  { %v885_v9 = vpop.permute.xlu1 %432 }
 0x12b   :  { %v887_v10 = vpop.permute.xlu0 %428 }
 0x12c   :  { %v272_v11 = vpop.permute.xlu1 %271 }
 0x12d   :  { %v277_v12 = vsel %vm275_vm15, %v272_v11, %v274_v2  ;;  %v276_v13 = vsel %vm275_vm15, %v270_v0, %v272_v11 }
 0x12e   :  { %607 = vmatprep.subr.msk.bf16.mxu0 %vm278_vm0, %v277_v12  ;;  %v321_v14 = vsel %vm278_vm0, %v276_v13, 0 }
 0x12f   :  { %333 = vmatpush1.bf16.msra.mxu0 %v321_v14  ;;  %v497_v15 = vpop.permute.xlu0 %496 }
 0x130   :  { %v241_v16 = vpop.permute.xlu1 %240  ;;  %v501_v17 = vsel %vm275_vm15, %v497_v15, %v499_v1  ;;  %v500_v18 = vsel %vm275_vm15, %v495_v63, %v497_v15 }
 0x131   :  { %609 = vmatprep.subr.msk.bf16.mxu1 %vm278_vm0, %v501_v17  ;;  %v535_v19 = vsel %vm278_vm0, %v500_v18, 0  ;;  %v32_v17 = vld [vmem:[%s954_s1] sm:$0xf]  ;;  %s691_s1 = smov [#allocation5]  }
 0x132   :  { %547 = vmatpush1.bf16.msra.mxu1 %v535_v19  ;;  %s595_s7 = sshll.u32 %s691_s1, 4  ;;  %s596_s7 = int_to_ptr.vmem [resolvable:$true] %s595_s7 }
 0x133   :  { %v251_v20 = vpop.permute.xlu0 %250  ;;  %s650_s8 = scalar_lea.vmem %s596_s7, 512  ;;  %p655_p6 = scmp.lt.s32.totalorder %s596_s7, %s596_s7 }
 0x134   :  { %v255_v23 = vsel %vm254_vm2, %v249_v4, %v251_v20  ;;  %v256_v24 = vsel %vm254_vm2, %v251_v20, %v253_v3  ;;  %v469_v25 = vpop.permute.xlu1 %468  ;;  %p651_p5 = scmp.ne.s32.totalorder %s596_s7, %s650_s8  ;;  %p656_p7 = scmp.lt.s32.totalorder %s650_s8, %s650_s8 }
 0x135   :  { %v309_v26 = vsel %vm278_vm0, %v256_v24, %v265_v22  ;;  %v305_v27 = vsel %vm278_vm0, %v255_v23, %v264_v21 }
 0x136   :  { %334 = vmatprep.subr.bf16.mxu0 %v309_v26  ;;  %p657_p8 = por %p656_p7, %p655_p6 }
 0x137   :  { %335 = vmatpush1.bf16.msra.mxu0 %v305_v27  ;;  %v478_v28 = vpop.permute.xlu0 %477 }
 0x138   :  { %v481_v32 = vsel %vm254_vm2, %v476_v6, %v478_v28  ;;  %v482_v43 = vsel %vm254_vm2, %v478_v28, %v480_v5  ;;  %v237_v44 = vpop.permute.xlu1 %236  ;;  %p658_p9 = pnand %p657_p8, %p651_p5 }
 0x139   :  { %v532_v45 = vsel %vm278_vm0, %v482_v43, %v490_v31  ;;  %v528_v46 = vsel %vm278_vm0, %v481_v32, %v489_v29 }
 0x13a   :  { %548 = vmatprep.subr.bf16.mxu1 %v532_v45 }
 0x13b   :  { %549 = vmatpush1.bf16.msra.mxu1 %v528_v46  ;;  %v200_v48 = vpop.permute.xlu0 %199 }
 0x13c   :  { %v465_v50 = vpop.permute.xlu1 %464  ;;  %v204_v60 = vsel %vm203_vm5, %v883_v8, %v200_v48  ;;  %v205_v63 = vsel %vm203_vm5, %v200_v48, %v881_v7 }
 0x13f   :  { %v431_v51 = vpop.permute.xlu0 %430 }
 0x140   :  { %v217_v52 = vpop.permute.xlu1 %216  ;;  %v434_v4 = vsel %vm203_vm5, %v887_v10, %v431_v51  ;;  %v435_v5 = vsel %vm203_vm5, %v431_v51, %v885_v9 }
 0x143   :  { %v239_v35 = vpop.permute.xlu0 %238 }
 0x144   :  { %v243_v53 = vsel %vm242_vm3, %v237_v44, %v239_v35  ;;  %v244_v30 = vsel %vm242_vm3, %v239_v35, %v241_v16  ;;  %v447_v33 = vpop.permute.xlu1 %446 }
 0x145   :  { %v301_v49 = vsel %vm278_vm0, %v869_v47, %v244_v30  ;;  %v297_v34 = vsel %vm278_vm0, %v873_v55, %v243_v53  ;;  %v193_v47 = vsel %vm191_vm4, %v879_v62, %v877_v61 }
 0x146   :  { %336 = vmatprep.subr.bf16.mxu0 %v301_v49  ;;  %v285_v3 = vsel %vm278_vm0, %v754_v37, %v193_v47 }
 0x147   :  { %337 = vmatpush1.bf16.msra.mxu0 %v297_v34  ;;  %v467_v42 = vpop.permute.xlu0 %466 }
 0x148   :  { %v470_v36 = vsel %vm242_vm3, %v465_v50, %v467_v42  ;;  %v471_v41 = vsel %vm242_vm3, %v467_v42, %v469_v25  ;;  %v213_v57 = vpop.permute.xlu1 %212 }
 0x149   :  { %v524_v58 = vsel %vm278_vm0, %v871_v54, %v471_v41  ;;  %v520_v59 = vsel %vm278_vm0, %v875_v56, %v470_v36 }
 0x14a   :  { %550 = vmatprep.subr.bf16.mxu1 %v524_v58 }
 0x14b   :  { %551 = vmatpush1.bf16.msra.mxu1 %v520_v59  ;;  %v215_v55 = vpop.permute.xlu0 %214 }
 0x14c   :  { %v219_v0 = vsel %vm218_vm6, %v213_v57, %v215_v55  ;;  %v220_v54 = vsel %vm218_vm6, %v215_v55, %v217_v52  ;;  %v443_v1 = vpop.permute.xlu1 %442 }
 0x14d   :  { %v293_v56 = vsel %vm278_vm0, %v205_v63, %v220_v54  ;;  %v289_v2 = vsel %vm278_vm0, %v204_v60, %v219_v0 }
 0x14e   :  { %338 = vmatprep.subr.bf16.mxu0 %v293_v56 }
 0x14f   :  { %339 = vmatpush1.bf16.msra.mxu0 %v289_v2  ;;  %v445_v61 = vpop.permute.xlu0 %444 }
 0x150   :  { %v448_v6 = vsel %vm218_vm6, %v443_v1, %v445_v61  ;;  %v449_v7 = vsel %vm218_vm6, %v445_v61, %v447_v33  ;;  %v422_v8 = vpop.permute.xlu1 %421  ;;  %340 = vmatprep.subr.bf16.mxu0 %v285_v3 }
 0x151   :  { %v516_v11 = vsel %vm278_vm0, %v435_v5, %v449_v7  ;;  %v512_v12 = vsel %vm278_vm0, %v434_v4, %v448_v6 }
 0x152   :  { %552 = vmatprep.subr.bf16.mxu1 %v516_v11 }
 0x153   :  { %553 = vmatpush1.bf16.msra.mxu1 %v512_v12  ;;  %v420_v13 = vpop.permute.xlu0 %419 }
 0x154   :  { %v424_v37 = vsel %vm191_vm4, %v420_v13, %v422_v8  ;;  %v418_v14 = vpop.permute.xlu1 %417 }
 0x155   :  { %v423_v10 = vsel %vm191_vm4, %v418_v14, %v420_v13  ;;  %v508_v9 = vsel %vm278_vm0, %v757_v38, %v424_v37 }
 0x156   :  { %554 = vmatprep.subr.bf16.mxu1 %v508_v9  ;;  %v504_v15 = vsel %vm278_vm0, %v760_v39, %v423_v10 }
 0x157   :  { %555 = vmatpush1.bf16.msra.mxu1 %v504_v15  ;;  %v186_v16 = vpop.permute.xlu0 %185 }
 0x158   :  { %v192_v18 = vsel %vm191_vm4, %v186_v16, %v879_v62 }
 0x159   :  { %v281_v19 = vsel %vm278_vm0, %v763_v40, %v192_v18 }
 0x15a   :  { %341 = vmatpush1.bf16.msra.mxu0 %v281_v19  ;;  %610 = vmatmul.mubr.msk.bf16.vlgmr.msra.gmra.mxu1 %vm316_vm7, %v32_v17 }
 0x15d   :  { %608 = vmatmul.mubr.msk.bf16.vlgmr.msra.gmra.mxu0 %vm316_vm7, %v32_v17 }
 0x164   :  { %v314_v38 = vpop.permute.xlu0 %313 }
 0x21a   :  { %v574_v20 = vpop.f32.mrf.mxu1 }
 0x21b   :  { %v575_v21 = vadd.f32 %v574_v20, %v314_v38 }
 0x21c   :  { %v576_v39 = vpop.f32.mrf.mxu1 }
 0x21d   :  { %vm581_vm8 = vcmp.ge.f32.partialorder %v575_v21, 0.0  ;;  %v583_v22 = vmul.f32 0.2, %v575_v21  ;;  %v577_v23 = vadd.f32 %v576_v39, %v314_v38  ;;  %v360_v24 = vpop.f32.mrf.mxu0 }
 0x21e   :  { %v361_v25 = vadd.f32 %v360_v24, %v314_v38  ;;  %v578_v26 = vpop.f32.mrf.mxu1 }
 0x21f   :  { %v585_v27 = vsel %vm581_vm8, %v575_v21, %v583_v22  ;;  %vm582_vm9 = vcmp.ge.f32.partialorder %v577_v23, 0.0  ;;  %v584_v28 = vmul.f32 0.2, %v577_v23  ;;  %v362_v62 = vpop.f32.mrf.mxu0 }
 0x220   :  { %588 = vst [vmem:[#allocation5 + $0x10] sm:$0xff] %v585_v27  ;;  %vm367_vm10 = vcmp.ge.f32.partialorder %v361_v25, 0.0  ;;  %v369_v40 = vmul.f32 0.2, %v361_v25  ;;  %v363_v29 = vadd.f32 %v362_v62, %v314_v38  ;;  %v579_v31 = vpop.f32.mrf.mxu1 }
 0x221   :  { %v586_v32 = vsel %vm582_vm9, %v577_v23, %v584_v28  ;;  %v364_v43 = vpop.f32.mrf.mxu0 }
 0x222   :  { %589 = vst [vmem:[#allocation5 + $0x18] sm:$0xff] %v586_v32  ;;  %v371_v44 = vsel %vm367_vm10, %v361_v25, %v369_v40  ;;  %vm368_vm11 = vcmp.ge.f32.partialorder %v363_v29, 0.0  ;;  %v370_v45 = vmul.f32 0.2, %v363_v29 }
 0x223   :  { %373 = vst [vmem:[#allocation5] sm:$0xff] %v371_v44  ;;  %v365_v46 = vpop.f32.mrf.mxu0 }
 0x224   :  { %v372_v48 = vsel %vm368_vm11, %v363_v29, %v370_v45 }
 0x225   :  { %374 = vst [vmem:[#allocation5 + $0x8] sm:$0xff] %v372_v48 }
 0x226   :  { %661 = shalt.err (!%p658_p9)
}
 0x227   :  { %601 = dma.vmem_to_hbm [thread:$0]  %s596_s7, 512, %s956_s3, [#allocation4], %s675_s15, %s675_s15, %s676_s16  }
 0x228   :  { %672 = dma.done.wait [#allocation4], 512  }
 0x229   :  { %673 = vsyncadd [#allocation4], 4294966784 }
 0x22a   :  { %605 = vsyncpa [#allocation3], 1 }
 0x22b   :  { %606 = vsyncpa [#allocation4], 1 }

</bundles_post_ra>
